<compile_context>
chip_gen: v7x
topology: tpu7x:2x2x1
jax: 0.10.0
libtpu: 0.0.40
codegen_flags: <defaults>
</compile_context>

<pallas_src>
import jax
import jax.numpy as jnp
import numpy as np
from jax.experimental import pallas as pl
from jax.experimental.pallas import tpu as pltpu


# ----------------------------- Pallas kernel ------------------------------ #
def revlstm_kernel(tok_ref, emb_ref, wih_ref, whh_ref, b_ref, fcw_ref, fcb_ref,
                   attn_ref, out_ref, xg_ref):
    """Embedding gather + LSTM scan + weighted mean + FC head, all in VMEM.

    tok_ref  : (B, T) int32  SMEM (scalar prefetch)
    emb_ref  : (V, E) f32    VMEM embedding table (padding row already zero)
    wih_ref  : (E, 4H) f32   VMEM
    whh_ref  : (H, 4H) f32   VMEM
    b_ref    : (1, 4H) f32   VMEM  (b_ih + b_hh)
    fcw_ref  : (1, H) f32    VMEM  (fc weight as a row)
    fcb_ref  : (1, 1) f32    VMEM
    attn_ref : (T,)  f32     SMEM  (attention weights already divided by T)
    out_ref  : (B, 1) f32    VMEM
    xg_ref   : (T*B, E) f32  VMEM scratch (time-major gathered embeddings)
    """
    B, T = tok_ref.shape
    H = whh_ref.shape[0]

    # ---- fused embedding gather, time-major rows (row index = t*B + b) ----
    for t in range(T):
        for b in range(B):
            xg_ref[t * B + b] = emb_ref[tok_ref[b, t]]

    # ---- input projection for every timestep in one flat MXU matmul ----
    xproj = jnp.dot(xg_ref[...], wih_ref[...],
                    preferred_element_type=jnp.float32) + b_ref[...]   # (T*B, 4H)

    whh = whh_ref[...]                                                 # (H, 4H)
    h = jnp.zeros((B, H), jnp.float32)
    c = jnp.zeros((B, H), jnp.float32)
    acc = jnp.zeros((B, H), jnp.float32)

    # ---- LSTM recurrence, fully unrolled (T static & small) ----
    # TODO(synk): for long sequences switch to lax.fori_loop(unroll=k) over a
    #             time-major (T, B, 4H) VMEM scratch instead of full unroll.
    for t in range(T):
        gates = xproj[t * B:(t + 1) * B, :] + jnp.dot(
            h, whh, preferred_element_type=jnp.float32)                # (B, 4H)
        sig = jax.nn.sigmoid(gates)     # one EUP pass over the full 128-lane vreg
        tnh = jnp.tanh(gates)           # one EUP pass over the full 128-lane vreg
        i = sig[:, 0 * H:1 * H]
        f = sig[:, 1 * H:2 * H]
        g = tnh[:, 2 * H:3 * H]
        o = sig[:, 3 * H:4 * H]
        c = f * c + i * g
        h = o * jnp.tanh(c)
        acc = acc + h * attn_ref[t]     # scalar SMEM weight (already / T)

    # ---- FC head on the VPU/XLU (avoid a lane-1 MXU matmul) ----
    logits = jnp.sum(acc * fcw_ref[...], axis=-1, keepdims=True) + fcb_ref[...]
    out_ref[...] = jax.nn.sigmoid(logits)


# ------------------------------ JAX wrapper -------------------------------- #
def revlstm_forward(x_tokens, params):
    B, T = x_tokens.shape
    E = params['embedding'].shape[1]
    H = params['whh_t'].shape[0]

    attn_scaled = (params['attn'] / T).reshape(T)          # fold 1/T, 1-D -> SMEM
    fcw_row = params['fcw'].reshape(1, H)                  # (H,1) -> (1,H)

    grid_spec = pltpu.PrefetchScalarGridSpec(
        num_scalar_prefetch=1,                             # x_tokens -> SMEM
        grid=(1,),
        in_specs=[
            pl.BlockSpec(memory_space=pltpu.MemorySpace.VMEM),   # embedding table
            pl.BlockSpec(memory_space=pltpu.MemorySpace.VMEM),   # wih_t
            pl.BlockSpec(memory_space=pltpu.MemorySpace.VMEM),   # whh_t
            pl.BlockSpec(memory_space=pltpu.MemorySpace.VMEM),   # bias
            pl.BlockSpec(memory_space=pltpu.MemorySpace.VMEM),   # fcw row
            pl.BlockSpec(memory_space=pltpu.MemorySpace.VMEM),   # fcb
            pl.BlockSpec(memory_space=pltpu.MemorySpace.SMEM),   # attn / T
        ],
        out_specs=pl.BlockSpec(memory_space=pltpu.MemorySpace.VMEM),
        scratch_shapes=[pltpu.VMEM((T * B, E), jnp.float32)],    # gathered emb
    )

    return pl.pallas_call(
        revlstm_kernel,
        out_shape=jax.ShapeDtypeStruct((B, 1), jnp.float32),
        grid_spec=grid_spec,
        compiler_params=pltpu.CompilerParams(
            dimension_semantics=("arbitrary",)),
    )(x_tokens.astype(jnp.int32), params['embedding'], params['wih_t'],
      params['whh_t'], params['bias'], fcw_row, params['fcb'], attn_scaled)


# --------------------------- pure-JAX reference ---------------------------- #
def revlstm_reference(x_tokens, params):
    emb = params['embedding'][x_tokens].astype(jnp.float32)   # (B, T, E)
    B, T, _ = emb.shape
    H = params['whh_t'].shape[0]

    def step(carry, x_t):
        h, c = carry
        gates = x_t @ params['wih_t'] + h @ params['whh_t'] + params['bias'][0]
        i = jax.nn.sigmoid(gates[:, 0 * H:1 * H])
        f = jax.nn.sigmoid(gates[:, 1 * H:2 * H])
        g = jnp.tanh(gates[:, 2 * H:3 * H])
        o = jax.nn.sigmoid(gates[:, 3 * H:4 * H])
        c_new = f * c + i * g
        h_new = o * jnp.tanh(c_new)
        return (h_new, c_new), h_new

    h0 = jnp.zeros((B, H), jnp.float32)
    c0 = jnp.zeros((B, H), jnp.float32)
    _, hs = jax.lax.scan(step, (h0, c0), jnp.swapaxes(emb, 0, 1))  # (T, B, H)
    weighted = hs * params['attn'][0][:, None, None]
    final = weighted.mean(axis=0)                                  # (B, H)
    return jax.nn.sigmoid(final @ params['fcw'] + params['fcb'][0])


# ------------------------------- parameters -------------------------------- #
def init_params(key, vocab_size, embed_dim, hidden_dim, seq_len, pad_idx=0):
    ks = jax.random.split(key, 7)
    scale = 1.0 / np.sqrt(hidden_dim)
    emb = jax.random.normal(ks[0], (vocab_size, embed_dim), jnp.float32)
    emb = emb.at[pad_idx].set(0.0)                 # padding_idx row is zero
    return {
        'embedding': emb,
        # PyTorch weight_ih is (4H, E); we store the transpose (E, 4H).
        'wih_t': scale * jax.random.normal(ks[1], (embed_dim, 4 * hidden_dim),
                                           jnp.float32),
        'whh_t': scale * jax.random.normal(ks[2], (hidden_dim, 4 * hidden_dim),
                                           jnp.float32),
        # bias = b_ih + b_hh, kept as a single (1, 4H) row.
        'bias': scale * jax.random.normal(ks[3], (1, 4 * hidden_dim),
                                          jnp.float32),
        'attn': jax.random.normal(ks[4], (1, seq_len), jnp.float32),
        'fcw': scale * jax.random.normal(ks[5], (hidden_dim, 1), jnp.float32),
        'fcb': scale * jax.random.normal(ks[6], (1, 1), jnp.float32),
    }


if __name__ == "__main__":
    VOCAB, EMBED, HIDDEN, SEQ, BATCH = 20, 16, 32, 8, 2

    key = jax.random.PRNGKey(0)
    k_par, k_tok = jax.random.split(key)
    params = init_params(k_par, VOCAB, EMBED, HIDDEN, SEQ)
    x_tokens = jax.random.randint(k_tok, (BATCH, SEQ), 0, VOCAB, dtype=jnp.int32)

    out = revlstm_forward(x_tokens, params)
    out = jax.block_until_ready(out)

    ref = jax.block_until_ready(revlstm_reference(x_tokens, params))
    np.testing.assert_allclose(np.asarray(out), np.asarray(ref),
                               rtol=1e-5, atol=1e-5)

    assert out.shape == (BATCH, 1)
    print("KERNEL_OK")
</pallas_src>

<mosaic_0001>
module attributes {stable_mosaic.version = 11 : i64} {
  func.func @revlstm_kernel(%arg0: i32, %arg1: memref<2x8xi32, #tpu.memory_space<smem>>, %arg2: memref<20x16xf32, #tpu.memory_space<vmem>>, %arg3: memref<16x128xf32, #tpu.memory_space<vmem>>, %arg4: memref<32x128xf32, #tpu.memory_space<vmem>>, %arg5: memref<1x128xf32, #tpu.memory_space<vmem>>, %arg6: memref<1x32xf32, #tpu.memory_space<vmem>>, %arg7: memref<1x1xf32, #tpu.memory_space<vmem>>, %arg8: memref<8xf32, #tpu.memory_space<smem>>, %arg9: memref<2x1xf32, #tpu.memory_space<vmem>>, %arg10: memref<16x16xf32, #tpu.memory_space<vmem>>) attributes {dimension_semantics = [#tpu.dimension_semantics<arbitrary>], iteration_bounds = array<i64: 1>, scalar_prefetch = 1 : i64, scratch_operands = 1 : i64, tpu.core_type = #tpu.core_type<tc>, window_params = [{pipeline_mode = #tpu.pipeline_mode<synchronous>, transform_indices = @transform_0, window_bounds = array<i64: 20, 16>}, {pipeline_mode = #tpu.pipeline_mode<synchronous>, transform_indices = @transform_1, window_bounds = array<i64: 16, 128>}, {pipeline_mode = #tpu.pipeline_mode<synchronous>, transform_indices = @transform_2, window_bounds = array<i64: 32, 128>}, {pipeline_mode = #tpu.pipeline_mode<synchronous>, transform_indices = @transform_3, window_bounds = array<i64: 1, 128>}, {pipeline_mode = #tpu.pipeline_mode<synchronous>, transform_indices = @transform_4, window_bounds = array<i64: 1, 32>}, {pipeline_mode = #tpu.pipeline_mode<synchronous>, transform_indices = @transform_5, window_bounds = array<i64: 1, 1>}, {transform_indices = @transform_6, window_bounds = array<i64: 8>}, {pipeline_mode = #tpu.pipeline_mode<synchronous>, transform_indices = @transform_7, window_bounds = array<i64: 2, 1>}]} {
    %c0 = arith.constant 0 : index
    %c0_0 = arith.constant 0 : index
    %0 = memref.load %arg1[%c0, %c0_0] : memref<2x8xi32, #tpu.memory_space<smem>>
    %1 = arith.index_cast %0 : i32 to index
    %c0_1 = arith.constant 0 : index
    %2 = vector.load %arg2[%1, %c0_1] : memref<20x16xf32, #tpu.memory_space<vmem>>, vector<1x16xf32>
    %3 = vector.shape_cast %2 : vector<1x16xf32> to vector<16xf32>
    %c0_2 = arith.constant 0 : index
    %c0_3 = arith.constant 0 : index
    %4 = vector.load %arg10[%c0_2, %c0_3] : memref<16x16xf32, #tpu.memory_space<vmem>>, vector<1x16xf32>
    %5 = vector.shape_cast %4 : vector<1x16xf32> to vector<16xf32>
    %6 = vector.shape_cast %3 : vector<16xf32> to vector<1x16xf32>
    tpu.vector_store %arg10[%c0_2, %c0_3], %6 {strides = array<i32>} : memref<16x16xf32, #tpu.memory_space<vmem>>, vector<1x16xf32>,
    %c1 = arith.constant 1 : index
    %c0_4 = arith.constant 0 : index
    %7 = memref.load %arg1[%c1, %c0_4] : memref<2x8xi32, #tpu.memory_space<smem>>
    %8 = arith.index_cast %7 : i32 to index
    %c0_5 = arith.constant 0 : index
    %9 = vector.load %arg2[%8, %c0_5] : memref<20x16xf32, #tpu.memory_space<vmem>>, vector<1x16xf32>
    %10 = vector.shape_cast %9 : vector<1x16xf32> to vector<16xf32>
    %c1_6 = arith.constant 1 : index
    %c0_7 = arith.constant 0 : index
    %11 = vector.load %arg10[%c1_6, %c0_7] : memref<16x16xf32, #tpu.memory_space<vmem>>, vector<1x16xf32>
    %12 = vector.shape_cast %11 : vector<1x16xf32> to vector<16xf32>
    %13 = vector.shape_cast %10 : vector<16xf32> to vector<1x16xf32>
    tpu.vector_store %arg10[%c1_6, %c0_7], %13 {strides = array<i32>} : memref<16x16xf32, #tpu.memory_space<vmem>>, vector<1x16xf32>,
    %c0_8 = arith.constant 0 : index
    %c1_9 = arith.constant 1 : index
    %14 = memref.load %arg1[%c0_8, %c1_9] : memref<2x8xi32, #tpu.memory_space<smem>>
    %15 = arith.index_cast %14 : i32 to index
    %c0_10 = arith.constant 0 : index
    %16 = vector.load %arg2[%15, %c0_10] : memref<20x16xf32, #tpu.memory_space<vmem>>, vector<1x16xf32>
    %17 = vector.shape_cast %16 : vector<1x16xf32> to vector<16xf32>
    %c2 = arith.constant 2 : index
    %c0_11 = arith.constant 0 : index
    %18 = vector.load %arg10[%c2, %c0_11] : memref<16x16xf32, #tpu.memory_space<vmem>>, vector<1x16xf32>
    %19 = vector.shape_cast %18 : vector<1x16xf32> to vector<16xf32>
    %20 = vector.shape_cast %17 : vector<16xf32> to vector<1x16xf32>
    tpu.vector_store %arg10[%c2, %c0_11], %20 {strides = array<i32>} : memref<16x16xf32, #tpu.memory_space<vmem>>, vector<1x16xf32>,
    %c1_12 = arith.constant 1 : index
    %c1_13 = arith.constant 1 : index
    %21 = memref.load %arg1[%c1_12, %c1_13] : memref<2x8xi32, #tpu.memory_space<smem>>
    %22 = arith.index_cast %21 : i32 to index
    %c0_14 = arith.constant 0 : index
    %23 = vector.load %arg2[%22, %c0_14] : memref<20x16xf32, #tpu.memory_space<vmem>>, vector<1x16xf32>
    %24 = vector.shape_cast %23 : vector<1x16xf32> to vector<16xf32>
    %c3 = arith.constant 3 : index
    %c0_15 = arith.constant 0 : index
    %25 = vector.load %arg10[%c3, %c0_15] : memref<16x16xf32, #tpu.memory_space<vmem>>, vector<1x16xf32>
    %26 = vector.shape_cast %25 : vector<1x16xf32> to vector<16xf32>
    %27 = vector.shape_cast %24 : vector<16xf32> to vector<1x16xf32>
    tpu.vector_store %arg10[%c3, %c0_15], %27 {strides = array<i32>} : memref<16x16xf32, #tpu.memory_space<vmem>>, vector<1x16xf32>,
    %c0_16 = arith.constant 0 : index
    %c2_17 = arith.constant 2 : index
    %28 = memref.load %arg1[%c0_16, %c2_17] : memref<2x8xi32, #tpu.memory_space<smem>>
    %29 = arith.index_cast %28 : i32 to index
    %c0_18 = arith.constant 0 : index
    %30 = vector.load %arg2[%29, %c0_18] : memref<20x16xf32, #tpu.memory_space<vmem>>, vector<1x16xf32>
    %31 = vector.shape_cast %30 : vector<1x16xf32> to vector<16xf32>
    %c4 = arith.constant 4 : index
    %c0_19 = arith.constant 0 : index
    %32 = vector.load %arg10[%c4, %c0_19] : memref<16x16xf32, #tpu.memory_space<vmem>>, vector<1x16xf32>
    %33 = vector.shape_cast %32 : vector<1x16xf32> to vector<16xf32>
    %34 = vector.shape_cast %31 : vector<16xf32> to vector<1x16xf32>
    tpu.vector_store %arg10[%c4, %c0_19], %34 {strides = array<i32>} : memref<16x16xf32, #tpu.memory_space<vmem>>, vector<1x16xf32>,
    %c1_20 = arith.constant 1 : index
    %c2_21 = arith.constant 2 : index
    %35 = memref.load %arg1[%c1_20, %c2_21] : memref<2x8xi32, #tpu.memory_space<smem>>
    %36 = arith.index_cast %35 : i32 to index
    %c0_22 = arith.constant 0 : index
    %37 = vector.load %arg2[%36, %c0_22] : memref<20x16xf32, #tpu.memory_space<vmem>>, vector<1x16xf32>
    %38 = vector.shape_cast %37 : vector<1x16xf32> to vector<16xf32>
    %c5 = arith.constant 5 : index
    %c0_23 = arith.constant 0 : index
    %39 = vector.load %arg10[%c5, %c0_23] : memref<16x16xf32, #tpu.memory_space<vmem>>, vector<1x16xf32>
    %40 = vector.shape_cast %39 : vector<1x16xf32> to vector<16xf32>
    %41 = vector.shape_cast %38 : vector<16xf32> to vector<1x16xf32>
    tpu.vector_store %arg10[%c5, %c0_23], %41 {strides = array<i32>} : memref<16x16xf32, #tpu.memory_space<vmem>>, vector<1x16xf32>,
    %c0_24 = arith.constant 0 : index
    %c3_25 = arith.constant 3 : index
    %42 = memref.load %arg1[%c0_24, %c3_25] : memref<2x8xi32, #tpu.memory_space<smem>>
    %43 = arith.index_cast %42 : i32 to index
    %c0_26 = arith.constant 0 : index
    %44 = vector.load %arg2[%43, %c0_26] : memref<20x16xf32, #tpu.memory_space<vmem>>, vector<1x16xf32>
    %45 = vector.shape_cast %44 : vector<1x16xf32> to vector<16xf32>
    %c6 = arith.constant 6 : index
    %c0_27 = arith.constant 0 : index
    %46 = vector.load %arg10[%c6, %c0_27] : memref<16x16xf32, #tpu.memory_space<vmem>>, vector<1x16xf32>
    %47 = vector.shape_cast %46 : vector<1x16xf32> to vector<16xf32>
    %48 = vector.shape_cast %45 : vector<16xf32> to vector<1x16xf32>
    tpu.vector_store %arg10[%c6, %c0_27], %48 {strides = array<i32>} : memref<16x16xf32, #tpu.memory_space<vmem>>, vector<1x16xf32>,
    %c1_28 = arith.constant 1 : index
    %c3_29 = arith.constant 3 : index
    %49 = memref.load %arg1[%c1_28, %c3_29] : memref<2x8xi32, #tpu.memory_space<smem>>
    %50 = arith.index_cast %49 : i32 to index
    %c0_30 = arith.constant 0 : index
    %51 = vector.load %arg2[%50, %c0_30] : memref<20x16xf32, #tpu.memory_space<vmem>>, vector<1x16xf32>
    %52 = vector.shape_cast %51 : vector<1x16xf32> to vector<16xf32>
    %c7 = arith.constant 7 : index
    %c0_31 = arith.constant 0 : index
    %53 = vector.load %arg10[%c7, %c0_31] : memref<16x16xf32, #tpu.memory_space<vmem>>, vector<1x16xf32>
    %54 = vector.shape_cast %53 : vector<1x16xf32> to vector<16xf32>
    %55 = vector.shape_cast %52 : vector<16xf32> to vector<1x16xf32>
    tpu.vector_store %arg10[%c7, %c0_31], %55 {strides = array<i32>} : memref<16x16xf32, #tpu.memory_space<vmem>>, vector<1x16xf32>,
    %c0_32 = arith.constant 0 : index
    %c4_33 = arith.constant 4 : index
    %56 = memref.load %arg1[%c0_32, %c4_33] : memref<2x8xi32, #tpu.memory_space<smem>>
    %57 = arith.index_cast %56 : i32 to index
    %c0_34 = arith.constant 0 : index
    %58 = vector.load %arg2[%57, %c0_34] : memref<20x16xf32, #tpu.memory_space<vmem>>, vector<1x16xf32>
    %59 = vector.shape_cast %58 : vector<1x16xf32> to vector<16xf32>
    %c8 = arith.constant 8 : index
    %c0_35 = arith.constant 0 : index
    %60 = vector.load %arg10[%c8, %c0_35] : memref<16x16xf32, #tpu.memory_space<vmem>>, vector<1x16xf32>
    %61 = vector.shape_cast %60 : vector<1x16xf32> to vector<16xf32>
    %62 = vector.shape_cast %59 : vector<16xf32> to vector<1x16xf32>
    tpu.vector_store %arg10[%c8, %c0_35], %62 {strides = array<i32>} : memref<16x16xf32, #tpu.memory_space<vmem>>, vector<1x16xf32>,
    %c1_36 = arith.constant 1 : index
    %c4_37 = arith.constant 4 : index
    %63 = memref.load %arg1[%c1_36, %c4_37] : memref<2x8xi32, #tpu.memory_space<smem>>
    %64 = arith.index_cast %63 : i32 to index
    %c0_38 = arith.constant 0 : index
    %65 = vector.load %arg2[%64, %c0_38] : memref<20x16xf32, #tpu.memory_space<vmem>>, vector<1x16xf32>
    %66 = vector.shape_cast %65 : vector<1x16xf32> to vector<16xf32>
    %c9 = arith.constant 9 : index
    %c0_39 = arith.constant 0 : index
    %67 = vector.load %arg10[%c9, %c0_39] : memref<16x16xf32, #tpu.memory_space<vmem>>, vector<1x16xf32>
    %68 = vector.shape_cast %67 : vector<1x16xf32> to vector<16xf32>
    %69 = vector.shape_cast %66 : vector<16xf32> to vector<1x16xf32>
    tpu.vector_store %arg10[%c9, %c0_39], %69 {strides = array<i32>} : memref<16x16xf32, #tpu.memory_space<vmem>>, vector<1x16xf32>,
    %c0_40 = arith.constant 0 : index
    %c5_41 = arith.constant 5 : index
    %70 = memref.load %arg1[%c0_40, %c5_41] : memref<2x8xi32, #tpu.memory_space<smem>>
    %71 = arith.index_cast %70 : i32 to index
    %c0_42 = arith.constant 0 : index
    %72 = vector.load %arg2[%71, %c0_42] : memref<20x16xf32, #tpu.memory_space<vmem>>, vector<1x16xf32>
    %73 = vector.shape_cast %72 : vector<1x16xf32> to vector<16xf32>
    %c10 = arith.constant 10 : index
    %c0_43 = arith.constant 0 : index
    %74 = vector.load %arg10[%c10, %c0_43] : memref<16x16xf32, #tpu.memory_space<vmem>>, vector<1x16xf32>
    %75 = vector.shape_cast %74 : vector<1x16xf32> to vector<16xf32>
    %76 = vector.shape_cast %73 : vector<16xf32> to vector<1x16xf32>
    tpu.vector_store %arg10[%c10, %c0_43], %76 {strides = array<i32>} : memref<16x16xf32, #tpu.memory_space<vmem>>, vector<1x16xf32>,
    %c1_44 = arith.constant 1 : index
    %c5_45 = arith.constant 5 : index
    %77 = memref.load %arg1[%c1_44, %c5_45] : memref<2x8xi32, #tpu.memory_space<smem>>
    %78 = arith.index_cast %77 : i32 to index
    %c0_46 = arith.constant 0 : index
    %79 = vector.load %arg2[%78, %c0_46] : memref<20x16xf32, #tpu.memory_space<vmem>>, vector<1x16xf32>
    %80 = vector.shape_cast %79 : vector<1x16xf32> to vector<16xf32>
    %c11 = arith.constant 11 : index
    %c0_47 = arith.constant 0 : index
    %81 = vector.load %arg10[%c11, %c0_47] : memref<16x16xf32, #tpu.memory_space<vmem>>, vector<1x16xf32>
    %82 = vector.shape_cast %81 : vector<1x16xf32> to vector<16xf32>
    %83 = vector.shape_cast %80 : vector<16xf32> to vector<1x16xf32>
    tpu.vector_store %arg10[%c11, %c0_47], %83 {strides = array<i32>} : memref<16x16xf32, #tpu.memory_space<vmem>>, vector<1x16xf32>,
    %c0_48 = arith.constant 0 : index
    %c6_49 = arith.constant 6 : index
    %84 = memref.load %arg1[%c0_48, %c6_49] : memref<2x8xi32, #tpu.memory_space<smem>>
    %85 = arith.index_cast %84 : i32 to index
    %c0_50 = arith.constant 0 : index
    %86 = vector.load %arg2[%85, %c0_50] : memref<20x16xf32, #tpu.memory_space<vmem>>, vector<1x16xf32>
    %87 = vector.shape_cast %86 : vector<1x16xf32> to vector<16xf32>
    %c12 = arith.constant 12 : index
    %c0_51 = arith.constant 0 : index
    %88 = vector.load %arg10[%c12, %c0_51] : memref<16x16xf32, #tpu.memory_space<vmem>>, vector<1x16xf32>
    %89 = vector.shape_cast %88 : vector<1x16xf32> to vector<16xf32>
    %90 = vector.shape_cast %87 : vector<16xf32> to vector<1x16xf32>
    tpu.vector_store %arg10[%c12, %c0_51], %90 {strides = array<i32>} : memref<16x16xf32, #tpu.memory_space<vmem>>, vector<1x16xf32>,
    %c1_52 = arith.constant 1 : index
    %c6_53 = arith.constant 6 : index
    %91 = memref.load %arg1[%c1_52, %c6_53] : memref<2x8xi32, #tpu.memory_space<smem>>
    %92 = arith.index_cast %91 : i32 to index
    %c0_54 = arith.constant 0 : index
    %93 = vector.load %arg2[%92, %c0_54] : memref<20x16xf32, #tpu.memory_space<vmem>>, vector<1x16xf32>
    %94 = vector.shape_cast %93 : vector<1x16xf32> to vector<16xf32>
    %c13 = arith.constant 13 : index
    %c0_55 = arith.constant 0 : index
    %95 = vector.load %arg10[%c13, %c0_55] : memref<16x16xf32, #tpu.memory_space<vmem>>, vector<1x16xf32>
    %96 = vector.shape_cast %95 : vector<1x16xf32> to vector<16xf32>
    %97 = vector.shape_cast %94 : vector<16xf32> to vector<1x16xf32>
    tpu.vector_store %arg10[%c13, %c0_55], %97 {strides = array<i32>} : memref<16x16xf32, #tpu.memory_space<vmem>>, vector<1x16xf32>,
    %c0_56 = arith.constant 0 : index
    %c7_57 = arith.constant 7 : index
    %98 = memref.load %arg1[%c0_56, %c7_57] : memref<2x8xi32, #tpu.memory_space<smem>>
    %99 = arith.index_cast %98 : i32 to index
    %c0_58 = arith.constant 0 : index
    %100 = vector.load %arg2[%99, %c0_58] : memref<20x16xf32, #tpu.memory_space<vmem>>, vector<1x16xf32>
    %101 = vector.shape_cast %100 : vector<1x16xf32> to vector<16xf32>
    %c14 = arith.constant 14 : index
    %c0_59 = arith.constant 0 : index
    %102 = vector.load %arg10[%c14, %c0_59] : memref<16x16xf32, #tpu.memory_space<vmem>>, vector<1x16xf32>
    %103 = vector.shape_cast %102 : vector<1x16xf32> to vector<16xf32>
    %104 = vector.shape_cast %101 : vector<16xf32> to vector<1x16xf32>
    tpu.vector_store %arg10[%c14, %c0_59], %104 {strides = array<i32>} : memref<16x16xf32, #tpu.memory_space<vmem>>, vector<1x16xf32>,
    %c1_60 = arith.constant 1 : index
    %c7_61 = arith.constant 7 : index
    %105 = memref.load %arg1[%c1_60, %c7_61] : memref<2x8xi32, #tpu.memory_space<smem>>
    %106 = arith.index_cast %105 : i32 to index
    %c0_62 = arith.constant 0 : index
    %107 = vector.load %arg2[%106, %c0_62] : memref<20x16xf32, #tpu.memory_space<vmem>>, vector<1x16xf32>
    %108 = vector.shape_cast %107 : vector<1x16xf32> to vector<16xf32>
    %c15 = arith.constant 15 : index
    %c0_63 = arith.constant 0 : index
    %109 = vector.load %arg10[%c15, %c0_63] : memref<16x16xf32, #tpu.memory_space<vmem>>, vector<1x16xf32>
    %110 = vector.shape_cast %109 : vector<1x16xf32> to vector<16xf32>
    %111 = vector.shape_cast %108 : vector<16xf32> to vector<1x16xf32>
    tpu.vector_store %arg10[%c15, %c0_63], %111 {strides = array<i32>} : memref<16x16xf32, #tpu.memory_space<vmem>>, vector<1x16xf32>,
    %c0_64 = arith.constant 0 : index
    %c0_65 = arith.constant 0 : index
    %112 = vector.load %arg10[%c0_64, %c0_65] : memref<16x16xf32, #tpu.memory_space<vmem>>, vector<16x16xf32>
    %c0_66 = arith.constant 0 : index
    %c0_67 = arith.constant 0 : index
    %113 = vector.load %arg3[%c0_66, %c0_67] : memref<16x128xf32, #tpu.memory_space<vmem>>, vector<16x128xf32>
    %cst = arith.constant dense<0.000000e+00> : vector<16x128xf32>
    %114 = tpu.matmul %112, %113, %cst {dimension_numbers = #tpu.dot_dimension_numbers<[1], [0], [0], [1], [0, 0, 1, 1], [], []>} : vector<16x16xf32>, vector<16x128xf32>, vector<16x128xf32> -> vector<16x128xf32>
    %c0_68 = arith.constant 0 : index
    %c0_69 = arith.constant 0 : index
    %115 = vector.load %arg5[%c0_68, %c0_69] : memref<1x128xf32, #tpu.memory_space<vmem>>, vector<1x128xf32>
    %116 = vector.broadcast %115 : vector<1x128xf32> to vector<16x128xf32>
    %117 = arith.addf %114, %116 : vector<16x128xf32>
    %c0_70 = arith.constant 0 : index
    %c0_71 = arith.constant 0 : index
    %118 = vector.load %arg4[%c0_70, %c0_71] : memref<32x128xf32, #tpu.memory_space<vmem>>, vector<32x128xf32>
    %cst_72 = arith.constant 0.000000e+00 : f32
    %119 = vector.broadcast %cst_72 : f32 to vector<2x32xf32>
    %cst_73 = arith.constant 0.000000e+00 : f32
    %120 = vector.broadcast %cst_73 : f32 to vector<2x32xf32>
    %cst_74 = arith.constant 0.000000e+00 : f32
    %121 = vector.broadcast %cst_74 : f32 to vector<2x32xf32>
    %122 = vector.extract_strided_slice %117 {offsets = [0, 0], sizes = [2, 128], strides = [1, 1]} : vector<16x128xf32> to vector<2x128xf32>
    %cst_75 = arith.constant dense<0.000000e+00> : vector<2x128xf32>
    %123 = tpu.matmul %119, %118, %cst_75 {dimension_numbers = #tpu.dot_dimension_numbers<[1], [0], [0], [1], [0, 0, 1, 1], [], []>} : vector<2x32xf32>, vector<32x128xf32>, vector<2x128xf32> -> vector<2x128xf32>
    %124 = arith.addf %122, %123 : vector<2x128xf32>
    %125 = arith.negf %124 : vector<2x128xf32>
    %126 = math.exp %125 : vector<2x128xf32>
    %cst_76 = arith.constant 1.000000e+00 : f32
    %127 = vector.broadcast %cst_76 : f32 to vector<2x128xf32>
    %128 = arith.addf %127, %126 : vector<2x128xf32>
    %129 = arith.divf %127, %128 : vector<2x128xf32>
    %130 = math.tanh %124 : vector<2x128xf32>
    %131 = vector.extract_strided_slice %129 {offsets = [0, 0], sizes = [2, 32], strides = [1, 1]} : vector<2x128xf32> to vector<2x32xf32>
    %132 = vector.extract_strided_slice %129 {offsets = [0, 32], sizes = [2, 32], strides = [1, 1]} : vector<2x128xf32> to vector<2x32xf32>
    %133 = vector.extract_strided_slice %130 {offsets = [0, 64], sizes = [2, 32], strides = [1, 1]} : vector<2x128xf32> to vector<2x32xf32>
    %134 = vector.extract_strided_slice %129 {offsets = [0, 96], sizes = [2, 32], strides = [1, 1]} : vector<2x128xf32> to vector<2x32xf32>
    %135 = arith.mulf %132, %120 : vector<2x32xf32>
    %136 = arith.mulf %131, %133 : vector<2x32xf32>
    %137 = arith.addf %135, %136 : vector<2x32xf32>
    %138 = math.tanh %137 : vector<2x32xf32>
    %139 = arith.mulf %134, %138 : vector<2x32xf32>
    %c0_77 = arith.constant 0 : index
    %140 = memref.load %arg8[%c0_77] : memref<8xf32, #tpu.memory_space<smem>>
    %141 = vector.broadcast %140 : f32 to vector<2x32xf32>
    %142 = arith.mulf %139, %141 : vector<2x32xf32>
    %143 = arith.addf %121, %142 : vector<2x32xf32>
    %144 = vector.extract_strided_slice %117 {offsets = [2, 0], sizes = [2, 128], strides = [1, 1]} : vector<16x128xf32> to vector<2x128xf32>
    %cst_78 = arith.constant dense<0.000000e+00> : vector<2x128xf32>
    %145 = tpu.matmul %139, %118, %cst_78 {dimension_numbers = #tpu.dot_dimension_numbers<[1], [0], [0], [1], [0, 0, 1, 1], [], []>} : vector<2x32xf32>, vector<32x128xf32>, vector<2x128xf32> -> vector<2x128xf32>
    %146 = arith.addf %144, %145 : vector<2x128xf32>
    %147 = arith.negf %146 : vector<2x128xf32>
    %148 = math.exp %147 : vector<2x128xf32>
    %cst_79 = arith.constant 1.000000e+00 : f32
    %149 = vector.broadcast %cst_79 : f32 to vector<2x128xf32>
    %150 = arith.addf %149, %148 : vector<2x128xf32>
    %151 = arith.divf %149, %150 : vector<2x128xf32>
    %152 = math.tanh %146 : vector<2x128xf32>
    %153 = vector.extract_strided_slice %151 {offsets = [0, 0], sizes = [2, 32], strides = [1, 1]} : vector<2x128xf32> to vector<2x32xf32>
    %154 = vector.extract_strided_slice %151 {offsets = [0, 32], sizes = [2, 32], strides = [1, 1]} : vector<2x128xf32> to vector<2x32xf32>
    %155 = vector.extract_strided_slice %152 {offsets = [0, 64], sizes = [2, 32], strides = [1, 1]} : vector<2x128xf32> to vector<2x32xf32>
    %156 = vector.extract_strided_slice %151 {offsets = [0, 96], sizes = [2, 32], strides = [1, 1]} : vector<2x128xf32> to vector<2x32xf32>
    %157 = arith.mulf %154, %137 : vector<2x32xf32>
    %158 = arith.mulf %153, %155 : vector<2x32xf32>
    %159 = arith.addf %157, %158 : vector<2x32xf32>
    %160 = math.tanh %159 : vector<2x32xf32>
    %161 = arith.mulf %156, %160 : vector<2x32xf32>
    %c1_80 = arith.constant 1 : index
    %162 = memref.load %arg8[%c1_80] : memref<8xf32, #tpu.memory_space<smem>>
    %163 = vector.broadcast %162 : f32 to vector<2x32xf32>
    %164 = arith.mulf %161, %163 : vector<2x32xf32>
    %165 = arith.addf %143, %164 : vector<2x32xf32>
    %166 = vector.extract_strided_slice %117 {offsets = [4, 0], sizes = [2, 128], strides = [1, 1]} : vector<16x128xf32> to vector<2x128xf32>
    %cst_81 = arith.constant dense<0.000000e+00> : vector<2x128xf32>
    %167 = tpu.matmul %161, %118, %cst_81 {dimension_numbers = #tpu.dot_dimension_numbers<[1], [0], [0], [1], [0, 0, 1, 1], [], []>} : vector<2x32xf32>, vector<32x128xf32>, vector<2x128xf32> -> vector<2x128xf32>
    %168 = arith.addf %166, %167 : vector<2x128xf32>
    %169 = arith.negf %168 : vector<2x128xf32>
    %170 = math.exp %169 : vector<2x128xf32>
    %cst_82 = arith.constant 1.000000e+00 : f32
    %171 = vector.broadcast %cst_82 : f32 to vector<2x128xf32>
    %172 = arith.addf %171, %170 : vector<2x128xf32>
    %173 = arith.divf %171, %172 : vector<2x128xf32>
    %174 = math.tanh %168 : vector<2x128xf32>
    %175 = vector.extract_strided_slice %173 {offsets = [0, 0], sizes = [2, 32], strides = [1, 1]} : vector<2x128xf32> to vector<2x32xf32>
    %176 = vector.extract_strided_slice %173 {offsets = [0, 32], sizes = [2, 32], strides = [1, 1]} : vector<2x128xf32> to vector<2x32xf32>
    %177 = vector.extract_strided_slice %174 {offsets = [0, 64], sizes = [2, 32], strides = [1, 1]} : vector<2x128xf32> to vector<2x32xf32>
    %178 = vector.extract_strided_slice %173 {offsets = [0, 96], sizes = [2, 32], strides = [1, 1]} : vector<2x128xf32> to vector<2x32xf32>
    %179 = arith.mulf %176, %159 : vector<2x32xf32>
    %180 = arith.mulf %175, %177 : vector<2x32xf32>
    %181 = arith.addf %179, %180 : vector<2x32xf32>
    %182 = math.tanh %181 : vector<2x32xf32>
    %183 = arith.mulf %178, %182 : vector<2x32xf32>
    %c2_83 = arith.constant 2 : index
    %184 = memref.load %arg8[%c2_83] : memref<8xf32, #tpu.memory_space<smem>>
    %185 = vector.broadcast %184 : f32 to vector<2x32xf32>
    %186 = arith.mulf %183, %185 : vector<2x32xf32>
    %187 = arith.addf %165, %186 : vector<2x32xf32>
    %188 = vector.extract_strided_slice %117 {offsets = [6, 0], sizes = [2, 128], strides = [1, 1]} : vector<16x128xf32> to vector<2x128xf32>
    %cst_84 = arith.constant dense<0.000000e+00> : vector<2x128xf32>
    %189 = tpu.matmul %183, %118, %cst_84 {dimension_numbers = #tpu.dot_dimension_numbers<[1], [0], [0], [1], [0, 0, 1, 1], [], []>} : vector<2x32xf32>, vector<32x128xf32>, vector<2x128xf32> -> vector<2x128xf32>
    %190 = arith.addf %188, %189 : vector<2x128xf32>
    %191 = arith.negf %190 : vector<2x128xf32>
    %192 = math.exp %191 : vector<2x128xf32>
    %cst_85 = arith.constant 1.000000e+00 : f32
    %193 = vector.broadcast %cst_85 : f32 to vector<2x128xf32>
    %194 = arith.addf %193, %192 : vector<2x128xf32>
    %195 = arith.divf %193, %194 : vector<2x128xf32>
    %196 = math.tanh %190 : vector<2x128xf32>
    %197 = vector.extract_strided_slice %195 {offsets = [0, 0], sizes = [2, 32], strides = [1, 1]} : vector<2x128xf32> to vector<2x32xf32>
    %198 = vector.extract_strided_slice %195 {offsets = [0, 32], sizes = [2, 32], strides = [1, 1]} : vector<2x128xf32> to vector<2x32xf32>
    %199 = vector.extract_strided_slice %196 {offsets = [0, 64], sizes = [2, 32], strides = [1, 1]} : vector<2x128xf32> to vector<2x32xf32>
    %200 = vector.extract_strided_slice %195 {offsets = [0, 96], sizes = [2, 32], strides = [1, 1]} : vector<2x128xf32> to vector<2x32xf32>
    %201 = arith.mulf %198, %181 : vector<2x32xf32>
    %202 = arith.mulf %197, %199 : vector<2x32xf32>
    %203 = arith.addf %201, %202 : vector<2x32xf32>
    %204 = math.tanh %203 : vector<2x32xf32>
    %205 = arith.mulf %200, %204 : vector<2x32xf32>
    %c3_86 = arith.constant 3 : index
    %206 = memref.load %arg8[%c3_86] : memref<8xf32, #tpu.memory_space<smem>>
    %207 = vector.broadcast %206 : f32 to vector<2x32xf32>
    %208 = arith.mulf %205, %207 : vector<2x32xf32>
    %209 = arith.addf %187, %208 : vector<2x32xf32>
    %210 = vector.extract_strided_slice %117 {offsets = [8, 0], sizes = [2, 128], strides = [1, 1]} : vector<16x128xf32> to vector<2x128xf32>
    %cst_87 = arith.constant dense<0.000000e+00> : vector<2x128xf32>
    %211 = tpu.matmul %205, %118, %cst_87 {dimension_numbers = #tpu.dot_dimension_numbers<[1], [0], [0], [1], [0, 0, 1, 1], [], []>} : vector<2x32xf32>, vector<32x128xf32>, vector<2x128xf32> -> vector<2x128xf32>
    %212 = arith.addf %210, %211 : vector<2x128xf32>
    %213 = arith.negf %212 : vector<2x128xf32>
    %214 = math.exp %213 : vector<2x128xf32>
    %cst_88 = arith.constant 1.000000e+00 : f32
    %215 = vector.broadcast %cst_88 : f32 to vector<2x128xf32>
    %216 = arith.addf %215, %214 : vector<2x128xf32>
    %217 = arith.divf %215, %216 : vector<2x128xf32>
    %218 = math.tanh %212 : vector<2x128xf32>
    %219 = vector.extract_strided_slice %217 {offsets = [0, 0], sizes = [2, 32], strides = [1, 1]} : vector<2x128xf32> to vector<2x32xf32>
    %220 = vector.extract_strided_slice %217 {offsets = [0, 32], sizes = [2, 32], strides = [1, 1]} : vector<2x128xf32> to vector<2x32xf32>
    %221 = vector.extract_strided_slice %218 {offsets = [0, 64], sizes = [2, 32], strides = [1, 1]} : vector<2x128xf32> to vector<2x32xf32>
    %222 = vector.extract_strided_slice %217 {offsets = [0, 96], sizes = [2, 32], strides = [1, 1]} : vector<2x128xf32> to vector<2x32xf32>
    %223 = arith.mulf %220, %203 : vector<2x32xf32>
    %224 = arith.mulf %219, %221 : vector<2x32xf32>
    %225 = arith.addf %223, %224 : vector<2x32xf32>
    %226 = math.tanh %225 : vector<2x32xf32>
    %227 = arith.mulf %222, %226 : vector<2x32xf32>
    %c4_89 = arith.constant 4 : index
    %228 = memref.load %arg8[%c4_89] : memref<8xf32, #tpu.memory_space<smem>>
    %229 = vector.broadcast %228 : f32 to vector<2x32xf32>
    %230 = arith.mulf %227, %229 : vector<2x32xf32>
    %231 = arith.addf %209, %230 : vector<2x32xf32>
    %232 = vector.extract_strided_slice %117 {offsets = [10, 0], sizes = [2, 128], strides = [1, 1]} : vector<16x128xf32> to vector<2x128xf32>
    %cst_90 = arith.constant dense<0.000000e+00> : vector<2x128xf32>
    %233 = tpu.matmul %227, %118, %cst_90 {dimension_numbers = #tpu.dot_dimension_numbers<[1], [0], [0], [1], [0, 0, 1, 1], [], []>} : vector<2x32xf32>, vector<32x128xf32>, vector<2x128xf32> -> vector<2x128xf32>
    %234 = arith.addf %232, %233 : vector<2x128xf32>
    %235 = arith.negf %234 : vector<2x128xf32>
    %236 = math.exp %235 : vector<2x128xf32>
    %cst_91 = arith.constant 1.000000e+00 : f32
    %237 = vector.broadcast %cst_91 : f32 to vector<2x128xf32>
    %238 = arith.addf %237, %236 : vector<2x128xf32>
    %239 = arith.divf %237, %238 : vector<2x128xf32>
    %240 = math.tanh %234 : vector<2x128xf32>
    %241 = vector.extract_strided_slice %239 {offsets = [0, 0], sizes = [2, 32], strides = [1, 1]} : vector<2x128xf32> to vector<2x32xf32>
    %242 = vector.extract_strided_slice %239 {offsets = [0, 32], sizes = [2, 32], strides = [1, 1]} : vector<2x128xf32> to vector<2x32xf32>
    %243 = vector.extract_strided_slice %240 {offsets = [0, 64], sizes = [2, 32], strides = [1, 1]} : vector<2x128xf32> to vector<2x32xf32>
    %244 = vector.extract_strided_slice %239 {offsets = [0, 96], sizes = [2, 32], strides = [1, 1]} : vector<2x128xf32> to vector<2x32xf32>
    %245 = arith.mulf %242, %225 : vector<2x32xf32>
    %246 = arith.mulf %241, %243 : vector<2x32xf32>
    %247 = arith.addf %245, %246 : vector<2x32xf32>
    %248 = math.tanh %247 : vector<2x32xf32>
    %249 = arith.mulf %244, %248 : vector<2x32xf32>
    %c5_92 = arith.constant 5 : index
    %250 = memref.load %arg8[%c5_92] : memref<8xf32, #tpu.memory_space<smem>>
    %251 = vector.broadcast %250 : f32 to vector<2x32xf32>
    %252 = arith.mulf %249, %251 : vector<2x32xf32>
    %253 = arith.addf %231, %252 : vector<2x32xf32>
    %254 = vector.extract_strided_slice %117 {offsets = [12, 0], sizes = [2, 128], strides = [1, 1]} : vector<16x128xf32> to vector<2x128xf32>
    %cst_93 = arith.constant dense<0.000000e+00> : vector<2x128xf32>
    %255 = tpu.matmul %249, %118, %cst_93 {dimension_numbers = #tpu.dot_dimension_numbers<[1], [0], [0], [1], [0, 0, 1, 1], [], []>} : vector<2x32xf32>, vector<32x128xf32>, vector<2x128xf32> -> vector<2x128xf32>
    %256 = arith.addf %254, %255 : vector<2x128xf32>
    %257 = arith.negf %256 : vector<2x128xf32>
    %258 = math.exp %257 : vector<2x128xf32>
    %cst_94 = arith.constant 1.000000e+00 : f32
    %259 = vector.broadcast %cst_94 : f32 to vector<2x128xf32>
    %260 = arith.addf %259, %258 : vector<2x128xf32>
    %261 = arith.divf %259, %260 : vector<2x128xf32>
    %262 = math.tanh %256 : vector<2x128xf32>
    %263 = vector.extract_strided_slice %261 {offsets = [0, 0], sizes = [2, 32], strides = [1, 1]} : vector<2x128xf32> to vector<2x32xf32>
    %264 = vector.extract_strided_slice %261 {offsets = [0, 32], sizes = [2, 32], strides = [1, 1]} : vector<2x128xf32> to vector<2x32xf32>
    %265 = vector.extract_strided_slice %262 {offsets = [0, 64], sizes = [2, 32], strides = [1, 1]} : vector<2x128xf32> to vector<2x32xf32>
    %266 = vector.extract_strided_slice %261 {offsets = [0, 96], sizes = [2, 32], strides = [1, 1]} : vector<2x128xf32> to vector<2x32xf32>
    %267 = arith.mulf %264, %247 : vector<2x32xf32>
    %268 = arith.mulf %263, %265 : vector<2x32xf32>
    %269 = arith.addf %267, %268 : vector<2x32xf32>
    %270 = math.tanh %269 : vector<2x32xf32>
    %271 = arith.mulf %266, %270 : vector<2x32xf32>
    %c6_95 = arith.constant 6 : index
    %272 = memref.load %arg8[%c6_95] : memref<8xf32, #tpu.memory_space<smem>>
    %273 = vector.broadcast %272 : f32 to vector<2x32xf32>
    %274 = arith.mulf %271, %273 : vector<2x32xf32>
    %275 = arith.addf %253, %274 : vector<2x32xf32>
    %276 = vector.extract_strided_slice %117 {offsets = [14, 0], sizes = [2, 128], strides = [1, 1]} : vector<16x128xf32> to vector<2x128xf32>
    %cst_96 = arith.constant dense<0.000000e+00> : vector<2x128xf32>
    %277 = tpu.matmul %271, %118, %cst_96 {dimension_numbers = #tpu.dot_dimension_numbers<[1], [0], [0], [1], [0, 0, 1, 1], [], []>} : vector<2x32xf32>, vector<32x128xf32>, vector<2x128xf32> -> vector<2x128xf32>
    %278 = arith.addf %276, %277 : vector<2x128xf32>
    %279 = arith.negf %278 : vector<2x128xf32>
    %280 = math.exp %279 : vector<2x128xf32>
    %cst_97 = arith.constant 1.000000e+00 : f32
    %281 = vector.broadcast %cst_97 : f32 to vector<2x128xf32>
    %282 = arith.addf %281, %280 : vector<2x128xf32>
    %283 = arith.divf %281, %282 : vector<2x128xf32>
    %284 = math.tanh %278 : vector<2x128xf32>
    %285 = vector.extract_strided_slice %283 {offsets = [0, 0], sizes = [2, 32], strides = [1, 1]} : vector<2x128xf32> to vector<2x32xf32>
    %286 = vector.extract_strided_slice %283 {offsets = [0, 32], sizes = [2, 32], strides = [1, 1]} : vector<2x128xf32> to vector<2x32xf32>
    %287 = vector.extract_strided_slice %284 {offsets = [0, 64], sizes = [2, 32], strides = [1, 1]} : vector<2x128xf32> to vector<2x32xf32>
    %288 = vector.extract_strided_slice %283 {offsets = [0, 96], sizes = [2, 32], strides = [1, 1]} : vector<2x128xf32> to vector<2x32xf32>
    %289 = arith.mulf %286, %269 : vector<2x32xf32>
    %290 = arith.mulf %285, %287 : vector<2x32xf32>
    %291 = arith.addf %289, %290 : vector<2x32xf32>
    %292 = math.tanh %291 : vector<2x32xf32>
    %293 = arith.mulf %288, %292 : vector<2x32xf32>
    %c7_98 = arith.constant 7 : index
    %294 = memref.load %arg8[%c7_98] : memref<8xf32, #tpu.memory_space<smem>>
    %295 = vector.broadcast %294 : f32 to vector<2x32xf32>
    %296 = arith.mulf %293, %295 : vector<2x32xf32>
    %297 = arith.addf %275, %296 : vector<2x32xf32>
    %c0_99 = arith.constant 0 : index
    %c0_100 = arith.constant 0 : index
    %298 = vector.load %arg6[%c0_99, %c0_100] : memref<1x32xf32, #tpu.memory_space<vmem>>, vector<1x32xf32>
    %299 = vector.broadcast %298 : vector<1x32xf32> to vector<2x32xf32>
    %300 = arith.mulf %297, %299 : vector<2x32xf32>
    %cst_101 = arith.constant dense<0.000000e+00> : vector<2xf32>
    %301 = vector.multi_reduction <add>, %300, %cst_101 [1] : vector<2x32xf32> to vector<2xf32>
    %302 = vector.shape_cast %301 : vector<2xf32> to vector<2x1xf32>
    %c0_102 = arith.constant 0 : index
    %c0_103 = arith.constant 0 : index
    %303 = vector.load %arg7[%c0_102, %c0_103] : memref<1x1xf32, #tpu.memory_space<vmem>>, vector<1x1xf32>
    %304 = vector.broadcast %303 : vector<1x1xf32> to vector<2x1xf32>
    %305 = arith.addf %302, %304 : vector<2x1xf32>
    %306 = arith.negf %305 : vector<2x1xf32>
    %307 = math.exp %306 : vector<2x1xf32>
    %cst_104 = arith.constant 1.000000e+00 : f32
    %308 = vector.broadcast %cst_104 : f32 to vector<2x1xf32>
    %309 = arith.addf %308, %307 : vector<2x1xf32>
    %310 = arith.divf %308, %309 : vector<2x1xf32>
    %c0_105 = arith.constant 0 : index
    %c0_106 = arith.constant 0 : index
    %311 = vector.load %arg9[%c0_105, %c0_106] : memref<2x1xf32, #tpu.memory_space<vmem>>, vector<2x1xf32>
    tpu.vector_store %arg9[%c0_105, %c0_106], %310 {strides = array<i32>} : memref<2x1xf32, #tpu.memory_space<vmem>>, vector<2x1xf32>,
    return
  }
  func.func @transform_0(%arg0: i32, %arg1: memref<2x8xi32, #tpu.memory_space<smem>>) -> (i32, i32) {
    %c0_i32 = arith.constant 0 : i32
    %c0_i32_0 = arith.constant 0 : i32
    %c0_i32_1 = arith.constant 0 : i32
    return %c0_i32, %c0_i32_0 : i32, i32
  }
  func.func @transform_1(%arg0: i32, %arg1: memref<2x8xi32, #tpu.memory_space<smem>>) -> (i32, i32) {
    %c0_i32 = arith.constant 0 : i32
    %c0_i32_0 = arith.constant 0 : i32
    %c0_i32_1 = arith.constant 0 : i32
    return %c0_i32, %c0_i32_0 : i32, i32
  }
  func.func @transform_2(%arg0: i32, %arg1: memref<2x8xi32, #tpu.memory_space<smem>>) -> (i32, i32) {
    %c0_i32 = arith.constant 0 : i32
    %c0_i32_0 = arith.constant 0 : i32
    %c0_i32_1 = arith.constant 0 : i32
    return %c0_i32, %c0_i32_0 : i32, i32
  }
  func.func @transform_3(%arg0: i32, %arg1: memref<2x8xi32, #tpu.memory_space<smem>>) -> (i32, i32) {
    %c0_i32 = arith.constant 0 : i32
    %c0_i32_0 = arith.constant 0 : i32
    %c0_i32_1 = arith.constant 0 : i32
    return %c0_i32, %c0_i32_0 : i32, i32
  }
  func.func @transform_4(%arg0: i32, %arg1: memref<2x8xi32, #tpu.memory_space<smem>>) -> (i32, i32) {
    %c0_i32 = arith.constant 0 : i32
    %c0_i32_0 = arith.constant 0 : i32
    %c0_i32_1 = arith.constant 0 : i32
    return %c0_i32, %c0_i32_0 : i32, i32
  }
  func.func @transform_5(%arg0: i32, %arg1: memref<2x8xi32, #tpu.memory_space<smem>>) -> (i32, i32) {
    %c0_i32 = arith.constant 0 : i32
    %c0_i32_0 = arith.constant 0 : i32
    %c0_i32_1 = arith.constant 0 : i32
    return %c0_i32, %c0_i32_0 : i32, i32
  }
  func.func @transform_6(%arg0: i32, %arg1: memref<2x8xi32, #tpu.memory_space<smem>>) -> i32 {
    %c0_i32 = arith.constant 0 : i32
    %c0_i32_0 = arith.constant 0 : i32
    return %c0_i32 : i32
  }
  func.func @transform_7(%arg0: i32, %arg1: memref<2x8xi32, #tpu.memory_space<smem>>) -> (i32, i32) {
    %c0_i32 = arith.constant 0 : i32
    %c0_i32_0 = arith.constant 0 : i32
    %c0_i32_1 = arith.constant 0 : i32
    return %c0_i32, %c0_i32_0 : i32, i32
  }
}

</mosaic_0001>

<bundles_post_ra>
// kernel: tpu_custom_call.1
= control target key start
LH: loop header
LB: loop body
LE: loop exit
PB: predicated region body
PF: predicated region fallthrough
CT: control target
= control target key end

     0   :  { %s1791_s0 = inlined_call_operand.vmem [shape: s32[2,8], index: 0, kind: input, shape index: {}]   ;;  %s1792_s1 = inlined_call_operand.vmem [shape: f32[20,16], index: 1, kind: input, shape index: {}]   ;;  %s1793_s2 = inlined_call_operand.vmem [shape: f32[16,128], index: 2, kind: input, shape index: {}]   ;;  %s1794_s3 = inlined_call_operand.vmem [shape: f32[32,128], index: 3, kind: input, shape index: {}]   ;;  %s1795_s4 = inlined_call_operand.vmem [shape: f32[1,128], index: 4, kind: input, shape index: {}]   ;;  %s1796_s5 = inlined_call_operand.vmem [shape: f32[1,32], index: 5, kind: input, shape index: {}]   ;;  %s1797_s7 = inlined_call_operand.vmem [shape: f32[8], index: 7, kind: input, shape index: {}]   ;;  %s1798_s8 = inlined_call_operand.vmem [shape: f32[2,1], index: 8, kind: output, shape index: {}]   ;;  %s1799_s6 = inlined_call_operand.<no memory space> [shape: f32[1,1], index: 6, kind: input, shape index: {}]  }
   0x1   :  { %s13_s29 = sshll.u32 %s1791_s0, 4  ;;  %v17_v0 = vstv %s1799_s6  ;;  %s14_s29 = int_to_ptr.vmem [resolvable:$true] %s13_s29 }
   0x2   :  { %18 = vst [vmem:[#allocation5] sm:$0x1] %v17_v0  ;;  %s1468_s10 = scalar_lea.vmem %s14_s29, 32  ;;  %p1473_p1 = scmp.lt.s32.totalorder %s14_s29, %s14_s29 }
   0x3   :  { %p1469_p0 = scmp.ne.s32.totalorder %s14_s29, %s1468_s10  ;;  %p1474_p2 = scmp.lt.s32.totalorder %s1468_s10, %s1468_s10 }
   0x5   :  { %p1475_p3 = por %p1474_p2, %p1473_p1 }
   0x7   :  { %p1476_p4 = pnand %p1475_p3, %p1469_p0 }
   0x9   :  { %1479 = shalt.err (!%p1476_p4)  }
   0xa   :  { %s1496_s11 = smov [#allocation4]  }
   0xb   :  { %16 = dma.vmem_to_smem %s14_s29, 32, %s1496_s11, [#allocation3] }
   0xc   :  { %1492 = dma.done.wait [#allocation3], 32 }
   0xd   :  { %1493 = vsyncadd [#allocation3], 4294967264 }
   0xe   :  { %20 = sfence }
   0xf   :  { %21 = vsyncpa [#allocation7], 0  ;;  %s40_s13 = sshll.u32 %s1797_s7, 4  ;;  %s41_s13 = int_to_ptr.vmem [resolvable:$true] %s40_s13 }
  0x10   :  { %s1480_s6 = scalar_lea.vmem %s41_s13, 16  ;;  %p1485_p6 = scmp.lt.s32.totalorder %s41_s13, %s41_s13 }
  0x11   :  { %p1481_p5 = scmp.ne.s32.totalorder %s41_s13, %s1480_s6  ;;  %p1486_p7 = scmp.lt.s32.totalorder %s1480_s6, %s1480_s6 }
  0x13   :  { %p1487_p8 = por %p1486_p7, %p1485_p6 }
  0x15   :  { %p1488_p9 = pnand %p1487_p8, %p1481_p5 }
  0x17   :  { %1491 = shalt.err (!%p1488_p9)
}
  0x18   :  { %s1497_s14 = smov [#allocation6]  }
  0x19   :  { %43 = dma.vmem_to_smem %s41_s13, 16, %s1497_s14, [#allocation7]  }
  0x1a   :  { %1494 = dma.done.wait [#allocation7], 16  }
  0x1b   :  { %1495 = vsyncadd [#allocation7], 4294967280 }
  0x1c   :  { %47 = sfence }
  0x1d   :  { %v206_v1 = vld [vmem:[%s1794_s3] sm:$0xff]  ;;  %v207_v2 = vld [vmem:[%s1794_s3 + $0x8] sm:$0xff]  ;;  %s1567_s20 = sld [smem:[#allocation4]]  ;;  %v1498_v4 = vmov 0.0|0.0   ;;  %s1577_s24 = sld [smem:[#allocation4 + $0x1]]  ;;  %v208_v8 = vld [vmem:[%s1794_s3 + $0x10] sm:$0xff] }
  0x1e   :  { %v115_v3 = vld [vmem:[%s1793_s2] sm:$0xff]  ;;  %1344 = vmatprep.subr.bf16.mxu1 %v1498_v4  ;;  %v1570_v5 = vpack.c.bf16 %v207_v2, %v206_v1  ;;  %v116_v6 = vld [vmem:[%s1793_s2 + $0x8] sm:$0xff]  ;;  %s1575_s23 = sld [smem:[#allocation4 + $0x80]]  ;;  %s1579_s25 = sld [smem:[#allocation4 + $0x81]]  ;;  %v209_v9 = vld [vmem:[%s1794_s3 + $0x18] sm:$0xff]  ;;  %vm51_vm0 = vcmask 122880  }
  0x1f   :  { %v1340_v7 = vpack.c.bf16 %v116_v6, %v115_v3  ;;  %s1581_s26 = sld [smem:[#allocation4 + $0x2]]  ;;  %s1589_s30 = sld [smem:[#allocation4 + $0x3]]  ;;  %v1597_v10 = vpack.c.bf16 %v209_v9, %v208_v8  ;;  %vm1499_vm1 = vmmov 0   ;;  %v1500_v11 = vmov 0.0   ;;  %v1173_v32 = vld [vmem:[%s1795_s4] ss:$0 sm:$0xff] }
  0x20   :  { %1346 = vmatpush3.bf16.msra.mxu1 %v1570_v5  ;;  %s1587_s29 = sld [smem:[#allocation4 + $0x82]]  ;;  %s1595_s10 = sld [smem:[#allocation4 + $0x83]]  ;;  %1260 = vmatprep.mubr.msk.f32.mxu1 %vm1499_vm1, %v1500_v11  ;;  %vm124_vm2 = vcmask 130048   ;;  %vm210_vm3 = vcmask 261120   ;;  %vm1117_vm4 = vcmask 254976   ;;  %vm1135_vm5 = vcmask 1024  }
  0x21   :  { %1341 = vmatprep.subr.bf16.mxu0 %v1340_v7  ;;  %1347 = vmatprep.subr.bf16.mxu1 %v1498_v4  ;;  %s1599_s11 = sld [smem:[#allocation4 + $0x4]]  ;;  %s1603_s12 = sld [smem:[#allocation4 + $0x5]] }
  0x22   :  { %1343 = vmatpush3.bf16.msra.mxu0 %v1340_v7  ;;  %s1601_s0 = sld [smem:[#allocation4 + $0x84]]  ;;  %s1611_s14 = sld [smem:[#allocation4 + $0x85]] }
  0x23   :  { %s49_s6 = scalar_lea.vmem %s1792_s1, %s1567_s20  ;;  %1350 = vmatprep.subr.bf16.mxu0 %v1498_v4  ;;  %s58_s19 = scalar_lea.vmem %s1792_s1, %s1577_s24 }
  0x24   :  { %v50_v12 = vld [vmem:[%s49_s6] sm:$0x1]  ;;  %s54_s17 = scalar_lea.vmem %s1792_s1, %s1575_s23  ;;  %1349 = vmatpush3.bf16.msra.mxu1 %v1597_v10  ;;  %s62_s22 = scalar_lea.vmem %s1792_s1, %s1579_s25 }
  0x25   :  { %52 = vst.msk [vmem:[#allocation2] sm:$0x1] %vm51_vm0, %v50_v12  ;;  %v55_v13 = vld [vmem:[%s54_s17] sm:$0x1]  ;;  %s66_s23 = scalar_lea.vmem %s1792_s1, %s1581_s26  ;;  %1356 = vmatprep.subr.bf16.mxu1 %v1498_v4  ;;  %s74_s13 = scalar_lea.vmem %s1792_s1, %s1589_s30 }
  0x26   :  { %v59_v14 = vld [vmem:[%s58_s19] sm:$0x1]  ;;  %56 = vst.msk [vmem:[#allocation2 + $0x1] sm:$0x1] %vm51_vm0, %v55_v13  ;;  %s70_s9 = scalar_lea.vmem %s1792_s1, %s1587_s29  ;;  %s78_s15 = scalar_lea.vmem %s1792_s1, %s1595_s10 }
  0x27   :  { %60 = vst.msk [vmem:[#allocation2 + $0x2] sm:$0x1] %vm51_vm0, %v59_v14  ;;  %v63_v15 = vld [vmem:[%s62_s22] sm:$0x1]  ;;  %s82_s18 = scalar_lea.vmem %s1792_s1, %s1599_s11  ;;  %1261 = vmatmul.mubr.f32.vlgmr.msra.gmra.mrb[0].mxu1 %v1500_v11  ;;  %s90_s10 = scalar_lea.vmem %s1792_s1, %s1603_s12 }
  0x28   :  { %v67_v16 = vld [vmem:[%s66_s23] sm:$0x1]  ;;  %64 = vst.msk [vmem:[#allocation2 + $0x3] sm:$0x1] %vm51_vm0, %v63_v15  ;;  %s86_s7 = scalar_lea.vmem %s1792_s1, %s1601_s0  ;;  %1358 = vmatpush3.bf16.msra.mxu1 %v1570_v5  ;;  %1282 = vmatprep.mubr.msk.f32.mxu1 %vm1499_vm1, %v1500_v11  ;;  %s94_s22 = scalar_lea.vmem %s1792_s1, %s1611_s14 }
  0x29   :  { %68 = vst.msk [vmem:[#allocation2 + $0x4] sm:$0x1] %vm51_vm0, %v67_v16  ;;  %v71_v17 = vld [vmem:[%s70_s9] sm:$0x1]  ;;  %s1169_s0 = sld [smem:[#allocation4 + $0x6]]  ;;  %1359 = vmatprep.subr.bf16.mxu1 %v1498_v4  ;;  %s1171_s27 = sld [smem:[#allocation4 + $0x7]] }
  0x2a   :  { %v75_v18 = vld [vmem:[%s74_s13] sm:$0x1]  ;;  %72 = vst.msk [vmem:[#allocation2 + $0x5] sm:$0x1] %vm51_vm0, %v71_v17  ;;  %s1170_s12 = sld [smem:[#allocation4 + $0x86]]  ;;  %s1172_s28 = sld [smem:[#allocation4 + $0x87]] }
  0x2b   :  { %76 = vst.msk [vmem:[#allocation2 + $0x6] sm:$0x1] %vm51_vm0, %v75_v18  ;;  %v79_v19 = vld [vmem:[%s78_s15] sm:$0x1]  ;;  %s1502_s4 = smov 32   ;;  %s1179_s29 = sld [smem:[#allocation6 + $0x1]] }
  0x2c   :  { %v83_v20 = vld [vmem:[%s82_s18] sm:$0x1]  ;;  %80 = vst.msk [vmem:[#allocation2 + $0x7] sm:$0x1] %vm51_vm0, %v79_v19  ;;  %1361 = vmatpush3.bf16.msra.mxu1 %v1597_v10  ;;  %s1501_s18 = smov 64   ;;  %s309_s30 = sld [smem:[#allocation6]] }
  0x2d   :  { %84 = vst.msk [vmem:[#allocation2 + $0x8] sm:$0x1] %vm51_vm0, %v83_v20  ;;  %v87_v21 = vld [vmem:[%s86_s7] sm:$0x1]  ;;  %1368 = vmatprep.subr.bf16.mxu1 %v1498_v4  ;;  %s1182_s7 = sld [smem:[#allocation6 + $0x2]]  ;;  %s1185_s19 = sld [smem:[#allocation6 + $0x3]] }
  0x2e   :  { %v91_v22 = vld [vmem:[%s90_s10] sm:$0x1]  ;;  %88 = vst.msk [vmem:[#allocation2 + $0x9] sm:$0x1] %vm51_vm0, %v87_v21  ;;  %s1188_s20 = sld [smem:[#allocation6 + $0x4]]  ;;  %s1191_s10 = sld [smem:[#allocation6 + $0x5]] }
  0x2f   :  { %92 = vst.msk [vmem:[#allocation2 + $0xa] sm:$0x1] %vm51_vm0, %v91_v22  ;;  %v95_v23 = vld [vmem:[%s94_s22] sm:$0x1]  ;;  %s98_s24 = scalar_lea.vmem %s1792_s1, %s1169_s0  ;;  %s106_s26 = scalar_lea.vmem %s1792_s1, %s1171_s27 }
  0x30   :  { %96 = vst.msk [vmem:[#allocation2 + $0xb] sm:$0x1] %vm51_vm0, %v95_v23  ;;  %v99_v25 = vld [vmem:[%s98_s24] sm:$0x1]  ;;  %s102_s3 = scalar_lea.vmem %s1792_s1, %s1170_s12  ;;  %s110_s16 = scalar_lea.vmem %s1792_s1, %s1172_s28 }
  0x31   :  { %100 = vst.msk [vmem:[#allocation2 + $0xc] sm:$0x1] %vm51_vm0, %v99_v25  ;;  %v103_v26 = vld [vmem:[%s102_s3] sm:$0x1]  ;;  %v420_v6 = vstv %s1179_s29  ;;  %s1194_s11 = sld [smem:[#allocation6 + $0x6]]  ;;  %s1503_s0 = smov 96  }
  0x32   :  { %v107_v27 = vld [vmem:[%s106_s26] sm:$0x1]  ;;  %104 = vst.msk [vmem:[#allocation2 + $0xd] sm:$0x1] %vm51_vm0, %v103_v26  ;;  %v310_v9 = vstv %s309_s30  ;;  %s1197_s12 = sld [smem:[#allocation6 + $0x7]] }
  0x33   :  { %v113_v24 = vld [vmem:[#allocation2] sm:$0xff]  ;;  %108 = vst.msk [vmem:[#allocation2 + $0xe] sm:$0x1] %vm51_vm0, %v107_v27 }
  0x34   :  { %1249 = vmatprep.mubr.msk.f32.mxu0 %vm124_vm2, %v113_v24  ;;  %v111_v28 = vld [vmem:[%s110_s16] sm:$0x1] }
  0x35   :  { %112 = vst.msk [vmem:[#allocation2 + $0xf] sm:$0x1] %vm51_vm0, %v111_v28 }
  0x3c   :  { %v114_v29 = vld [vmem:[#allocation2 + $0x8] sm:$0xff] }
  0x3d   :  { %1250 = vmatmul.mubr.msk.f32.vlgmr.msra.gmra.mrb[0].mxu0 %vm124_vm2, %v114_v29 }
  0x3e   :  { %1352 = vmatpush3.bf16.msra.mxu0 %v1570_v5  ;;  %1271 = vmatprep.mubr.msk.f32.mxu0 %vm1499_vm1, %v1500_v11 }
  0x3f   :  { %1353 = vmatprep.subr.bf16.mxu0 %v1498_v4 }
  0x42   :  { %1355 = vmatpush3.bf16.msra.mxu0 %v1597_v10 }
  0x43   :  { %1362 = vmatprep.subr.bf16.mxu0 %v1498_v4 }
  0xfa   :  { %v280_v30 = vpop.f32.mrb[0].mxu1 }
  0xfb   :  { %v1262_v31 = vpop.f32.mrb[1].mxu1 }
 0x110   :  { %v1251_v33 = vpop.f32.mrb[0].mxu0 }
 0x111   :  { %v1706_v34 = vadd.f32 %v1251_v33, %v1173_v32  ;;  %v197_v35 = vpop.f32.mrb[1].mxu0 }
 0x112   :  { %v1708_v36 = vadd.f32 %v1173_v32, %v197_v35  ;;  %v534_v35 = vstv %s1182_s7 }
 0x114   :  { %v284_v37 = vadd.f32 %v280_v30, %v1708_v36 }
 0x116   :  { %1400 = vtanh.f32 %v284_v37  ;;  %v1176_v39 = vmul.f32 -1.442695, %v284_v37 }
 0x118   :  { %1402 = vpow2.f32 %v1176_v39 }
 0x120   :  { %v1401_v38 = vpop.eup %1400 }
 0x121   :  { %294 = vrot.lane.b32.xlu0 %v1401_v38, %s1501_s18 }
 0x122   :  { %v1403_v40 = vpop.eup %1402 }
 0x123   :  { %v288_v41 = vadd.f32 1.0, %v1403_v40 }
 0x125   :  { %1404 = vrcp.f32 %v288_v41 }
 0x12f   :  { %v1405_v42 = vpop.eup %1404 }
 0x130   :  { %v292_v45 = vmul.f32 0.0, %v1405_v42 }
 0x193   :  { %v295_v43 = vpop.permute.xlu0 %294 }
 0x194   :  { %v297_v44 = vmul.f32 %v1405_v42, %v295_v43 }
 0x196   :  { %299 = vrot.lane.b32.xlu0 %v297_v44, %s1502_s4 }
 0x208   :  { %v300_v46 = vpop.permute.xlu0 %299 }
 0x209   :  { %v302_v47 = vadd.f32 %v300_v46, %v292_v45 }
 0x20b   :  { %1406 = vtanh.f32 %v302_v47  ;;  %v400_v63 = vrot.slane %v302_v47, 6 }
 0x215   :  { %v1407_v48 = vpop.eup %1406 }
 0x216   :  { %305 = vrot.lane.b32.xlu1 %v1407_v48, %s1501_s18 }
 0x288   :  { %v306_v49 = vpop.permute.xlu1 %305 }
 0x289   :  { %v308_v50 = vmul.f32 %v1405_v42, %v306_v49 }
 0x28b   :  { %314 = vrot.lane.b32.xlu1 %v308_v50, %s1502_s4  ;;  %v311_v14 = vmul.f32 %v310_v9, %v308_v50 }
 0x2fd   :  { %v315_v51 = vpop.permute.xlu1 %314 }
 0x2fe   :  { %1272 = vmatmul.mubr.msk.f32.vlgmr.msra.gmra.mrb[2].mxu0 %vm210_vm3, %v315_v51 }
 0x2ff   :  { %1364 = vmatpush3.bf16.msra.mxu0 %v1570_v5  ;;  %1293 = vmatprep.mubr.msk.f32.mxu0 %vm1499_vm1, %v1500_v11 }
 0x300   :  { %1365 = vmatprep.subr.bf16.mxu0 %v1498_v4 }
 0x303   :  { %1367 = vmatpush3.bf16.msra.mxu0 %v1597_v10 }
 0x304   :  { %1374 = vmatprep.subr.bf16.mxu0 %v1498_v4 }
 0x3d1   :  { %v384_v52 = vpop.f32.mrb[2].mxu0 }
 0x3d2   :  { %v389_v53 = vrot.slane %v384_v52, 6  ;;  %v1273_v54 = vpop.f32.mrb[3].mxu0 }
 0x3d4   :  { %v391_v55 = vadd.f32 %v389_v53, %v1708_v36 }
 0x3d6   :  { %1408 = vtanh.f32 %v391_v55  ;;  %v1178_v57 = vmul.f32 -1.442695, %v391_v55 }
 0x3d8   :  { %1410 = vpow2.f32 %v1178_v57 }
 0x3e0   :  { %v1409_v56 = vpop.eup %1408 }
 0x3e1   :  { %404 = vrot.lane.b32.xlu0 %v1409_v56, %s1501_s18 }
 0x3e2   :  { %v1411_v58 = vpop.eup %1410 }
 0x3e3   :  { %v395_v59 = vadd.f32 1.0, %v1411_v58 }
 0x3e5   :  { %1412 = vrcp.f32 %v395_v59  ;;  %v648_v59 = vstv %s1185_s19 }
 0x3ef   :  { %v1413_v60 = vpop.eup %1412 }
 0x3f0   :  { %v402_v0 = vmul.f32 %v1413_v60, %v400_v63 }
 0x453   :  { %v405_v61 = vpop.permute.xlu0 %404 }
 0x454   :  { %v407_v62 = vmul.f32 %v1413_v60, %v405_v61 }
 0x456   :  { %409 = vrot.lane.b32.xlu1 %v407_v62, %s1502_s4 }
 0x4c8   :  { %v410_v1 = vpop.permute.xlu1 %409 }
 0x4c9   :  { %v412_v2 = vadd.f32 %v410_v1, %v402_v0 }
 0x4cb   :  { %1414 = vtanh.f32 %v412_v2  ;;  %v514_v29 = vrot.slane %v412_v2, 6 }
 0x4d5   :  { %v1415_v3 = vpop.eup %1414 }
 0x4d6   :  { %415 = vrot.lane.b32.xlu0 %v1415_v3, %s1501_s18 }
 0x548   :  { %v416_v7 = vpop.permute.xlu0 %415 }
 0x549   :  { %v418_v8 = vmul.f32 %v1413_v60, %v416_v7 }
 0x54b   :  { %v421_v12 = vmul.f32 %v420_v6, %v418_v8  ;;  %v427_v13 = vrot.slane %v418_v8, 2 }
 0x54d   :  { %v423_v15 = vrot.slane %v421_v12, 2  ;;  %428 = vrot.lane.b32.xlu1 %v427_v13, %s1502_s4 }
 0x54f   :  { %v425_v16 = vadd.f32 %v423_v15, %v311_v14 }
 0x5bf   :  { %v429_v17 = vpop.permute.xlu1 %428 }
 0x5c0   :  { %1283 = vmatmul.mubr.msk.f32.vlgmr.msra.gmra.mrb[2].mxu1 %vm210_vm3, %v429_v17 }
 0x5c1   :  { %1370 = vmatpush3.bf16.msra.mxu1 %v1570_v5  ;;  %1304 = vmatprep.mubr.msk.f32.mxu1 %vm1499_vm1, %v1500_v11 }
 0x5c2   :  { %1371 = vmatprep.subr.bf16.mxu1 %v1498_v4 }
 0x5c5   :  { %1373 = vmatpush3.bf16.msra.mxu1 %v1597_v10 }
 0x5c6   :  { %1380 = vmatprep.subr.bf16.mxu1 %v1498_v4 }
 0x693   :  { %v498_v18 = vpop.f32.mrb[2].mxu1 }
 0x694   :  { %v503_v19 = vrot.slane %v498_v18, 4  ;;  %v1284_v20 = vpop.f32.mrb[3].mxu1 }
 0x696   :  { %v505_v21 = vadd.f32 %v503_v19, %v1708_v36 }
 0x698   :  { %1416 = vtanh.f32 %v505_v21  ;;  %v1181_v23 = vmul.f32 -1.442695, %v505_v21 }
 0x69a   :  { %1418 = vpow2.f32 %v1181_v23 }
 0x6a2   :  { %v1417_v22 = vpop.eup %1416 }
 0x6a3   :  { %518 = vrot.lane.b32.xlu0 %v1417_v22, %s1501_s18  ;;  %v759_v22 = vstv %s1188_s20 }
 0x6a4   :  { %v1419_v24 = vpop.eup %1418 }
 0x6a5   :  { %v509_v25 = vadd.f32 1.0, %v1419_v24 }
 0x6a7   :  { %1420 = vrcp.f32 %v509_v25 }
 0x6b1   :  { %v1421_v26 = vpop.eup %1420 }
 0x6b2   :  { %v516_v30 = vmul.f32 %v1421_v26, %v514_v29 }
 0x715   :  { %v519_v27 = vpop.permute.xlu0 %518 }
 0x716   :  { %v521_v28 = vmul.f32 %v1421_v26, %v519_v27 }
 0x718   :  { %523 = vrot.lane.b32.xlu1 %v521_v28, %s1502_s4 }
 0x78a   :  { %v524_v31 = vpop.permute.xlu1 %523 }
 0x78b   :  { %v526_v32 = vadd.f32 %v524_v31, %v516_v30 }
 0x78d   :  { %1422 = vtanh.f32 %v526_v32  ;;  %v628_v55 = vrot.slane %v526_v32, 6 }
 0x797   :  { %v1423_v33 = vpop.eup %1422 }
 0x798   :  { %529 = vrot.lane.b32.xlu0 %v1423_v33, %s1501_s18 }
 0x80a   :  { %v530_v37 = vpop.permute.xlu0 %529 }
 0x80b   :  { %v532_v38 = vmul.f32 %v1421_v26, %v530_v37 }
 0x80d   :  { %v535_v39 = vmul.f32 %v534_v35, %v532_v38  ;;  %v541_v40 = vrot.slane %v532_v38, 4 }
 0x80f   :  { %v537_v41 = vrot.slane %v535_v39, 4  ;;  %542 = vrot.lane.b32.xlu1 %v541_v40, %s1502_s4 }
 0x811   :  { %v539_v42 = vadd.f32 %v537_v41, %v425_v16 }
 0x881   :  { %v543_v43 = vpop.permute.xlu1 %542 }
 0x882   :  { %1294 = vmatmul.mubr.msk.f32.vlgmr.msra.gmra.mrb[4].mxu0 %vm210_vm3, %v543_v43 }
 0x883   :  { %1376 = vmatpush3.bf16.msra.mxu0 %v1570_v5  ;;  %1315 = vmatprep.mubr.msk.f32.mxu0 %vm1499_vm1, %v1500_v11 }
 0x884   :  { %1377 = vmatprep.subr.bf16.mxu0 %v1498_v4 }
 0x887   :  { %1379 = vmatpush3.bf16.msra.mxu0 %v1597_v10 }
 0x888   :  { %1386 = vmatprep.subr.bf16.mxu0 %v1498_v4 }
 0x955   :  { %v612_v44 = vpop.f32.mrb[4].mxu0 }
 0x956   :  { %v617_v45 = vrot.slane %v612_v44, 2  ;;  %v1295_v46 = vpop.f32.mrb[5].mxu0 }
 0x958   :  { %v619_v47 = vadd.f32 %v617_v45, %v1708_v36 }
 0x95a   :  { %1424 = vtanh.f32 %v619_v47  ;;  %v1184_v49 = vmul.f32 -1.442695, %v619_v47 }
 0x95c   :  { %1426 = vpow2.f32 %v1184_v49 }
 0x964   :  { %v1425_v48 = vpop.eup %1424 }
 0x965   :  { %632 = vrot.lane.b32.xlu0 %v1425_v48, %s1501_s18 }
 0x966   :  { %v1427_v50 = vpop.eup %1426 }
 0x967   :  { %v623_v51 = vadd.f32 1.0, %v1427_v50 }
 0x969   :  { %1428 = vrcp.f32 %v623_v51 }
 0x973   :  { %v1429_v52 = vpop.eup %1428 }
 0x974   :  { %v630_v56 = vmul.f32 %v1429_v52, %v628_v55 }
 0x9d7   :  { %v633_v53 = vpop.permute.xlu0 %632 }
 0x9d8   :  { %v635_v54 = vmul.f32 %v1429_v52, %v633_v53 }
 0x9da   :  { %637 = vrot.lane.b32.xlu1 %v635_v54, %s1502_s4 }
 0xa4c   :  { %v638_v57 = vpop.permute.xlu1 %637 }
 0xa4d   :  { %v640_v58 = vadd.f32 %v638_v57, %v630_v56 }
 0xa4f   :  { %1430 = vtanh.f32 %v640_v58  ;;  %v739_v17 = vrot.slane %v640_v58, 6 }
 0xa59   :  { %v1431_v36 = vpop.eup %1430 }
 0xa5a   :  { %643 = vrot.lane.b32.xlu0 %v1431_v36, %s1501_s18 }
 0xacc   :  { %v644_v60 = vpop.permute.xlu0 %643 }
 0xacd   :  { %v646_v61 = vmul.f32 %v1429_v52, %v644_v60 }
 0xacf   :  { %v649_v62 = vmul.f32 %v648_v59, %v646_v61  ;;  %v655_v63 = vrot.slane %v646_v61, 6 }
 0xad1   :  { %v651_v0 = vrot.slane %v649_v62, 6  ;;  %656 = vrot.lane.b32.xlu1 %v655_v63, %s1502_s4 }
 0xad3   :  { %v653_v1 = vadd.f32 %v651_v0, %v539_v42  ;;  %v869_v42 = vstv %s1191_s10 }
 0xb43   :  { %v657_v2 = vpop.permute.xlu1 %656 }
 0xb44   :  { %1305 = vmatmul.mubr.msk.f32.vlgmr.msra.gmra.mrb[4].mxu1 %vm210_vm3, %v657_v2 }
 0xb45   :  { %1382 = vmatpush3.bf16.msra.mxu1 %v1570_v5  ;;  %1326 = vmatprep.mubr.msk.f32.mxu1 %vm1499_vm1, %v1500_v11 }
 0xb46   :  { %1383 = vmatprep.subr.bf16.mxu1 %v1498_v4 }
 0xb49   :  { %1385 = vmatpush3.bf16.msra.mxu1 %v1597_v10 }
 0xc17   :  { %v726_v3 = vpop.f32.mrb[4].mxu1 }
 0xc18   :  { %v730_v6 = vadd.f32 %v726_v3, %v1706_v34  ;;  %v1306_v7 = vpop.f32.mrb[5].mxu1 }
 0xc1a   :  { %1432 = vtanh.f32 %v730_v6  ;;  %v1187_v9 = vmul.f32 -1.442695, %v730_v6 }
 0xc1c   :  { %1434 = vpow2.f32 %v1187_v9 }
 0xc24   :  { %v1433_v8 = vpop.eup %1432 }
 0xc25   :  { %743 = vrot.lane.b32.xlu0 %v1433_v8, %s1501_s18 }
 0xc26   :  { %v1435_v12 = vpop.eup %1434 }
 0xc27   :  { %v734_v13 = vadd.f32 1.0, %v1435_v12 }
 0xc29   :  { %1436 = vrcp.f32 %v734_v13 }
 0xc33   :  { %v1437_v14 = vpop.eup %1436 }
 0xc34   :  { %v741_v18 = vmul.f32 %v1437_v14, %v739_v17 }
 0xc97   :  { %v744_v15 = vpop.permute.xlu0 %743 }
 0xc98   :  { %v746_v16 = vmul.f32 %v1437_v14, %v744_v15 }
 0xc9a   :  { %748 = vrot.lane.b32.xlu1 %v746_v16, %s1502_s4 }
 0xd0c   :  { %v749_v19 = vpop.permute.xlu1 %748 }
 0xd0d   :  { %v751_v20 = vadd.f32 %v749_v19, %v741_v18 }
 0xd0f   :  { %1438 = vtanh.f32 %v751_v20 }
 0xd19   :  { %v1439_v21 = vpop.eup %1438 }
 0xd1a   :  { %754 = vrot.lane.b32.xlu0 %v1439_v21, %s1501_s18 }
 0xd8c   :  { %v755_v23 = vpop.permute.xlu0 %754 }
 0xd8d   :  { %v757_v24 = vmul.f32 %v1437_v14, %v755_v23 }
 0xd8f   :  { %v760_v25 = vmul.f32 %v759_v22, %v757_v24  ;;  %763 = vrot.lane.b32.xlu1 %v757_v24, %s1502_s4  ;;  %v1198_v24 = vld [vmem:[%s1796_s5] ss:$0 sm:$0xff] }
 0xd91   :  { %v761_v26 = vadd.f32 %v760_v25, %v653_v1  ;;  %v983_v1 = vstv %s1194_s11 }
 0xe01   :  { %v764_v27 = vpop.permute.xlu1 %763 }
 0xe02   :  { %1316 = vmatmul.mubr.msk.f32.vlgmr.msra.gmra.mrb[6].mxu0 %vm210_vm3, %v764_v27 }
 0xe03   :  { %1388 = vmatpush3.bf16.msra.mxu0 %v1570_v5  ;;  %1337 = vmatprep.mubr.msk.f32.mxu0 %vm1499_vm1, %v1500_v11 }
 0xe04   :  { %1389 = vmatprep.subr.bf16.mxu0 %v1498_v4  ;;  %v849_v4 = vrot.slane %v751_v20, 6 }
 0xe07   :  { %1391 = vmatpush3.bf16.msra.mxu0 %v1597_v10 }
 0xed5   :  { %v833_v28 = vpop.f32.mrb[6].mxu0 }
 0xed6   :  { %v838_v29 = vrot.slane %v833_v28, 6  ;;  %v1317_v30 = vpop.f32.mrb[7].mxu0 }
 0xed8   :  { %v840_v31 = vadd.f32 %v838_v29, %v1706_v34  ;;  %v1097_v29 = vstv %s1197_s12 }
 0xeda   :  { %1440 = vtanh.f32 %v840_v31  ;;  %v1190_v33 = vmul.f32 -1.442695, %v840_v31 }
 0xedc   :  { %1442 = vpow2.f32 %v1190_v33 }
 0xee4   :  { %v1441_v32 = vpop.eup %1440 }
 0xee5   :  { %853 = vrot.lane.b32.xlu0 %v1441_v32, %s1501_s18 }
 0xee6   :  { %v1443_v35 = vpop.eup %1442 }
 0xee7   :  { %v844_v5 = vadd.f32 1.0, %v1443_v35 }
 0xee9   :  { %1444 = vrcp.f32 %v844_v5 }
 0xef3   :  { %v1445_v37 = vpop.eup %1444 }
 0xef4   :  { %v851_v10 = vmul.f32 %v1445_v37, %v849_v4  ;;  %v1199_v4 = vld [vmem:[#allocation5] ss:$0 sm:$0xff] }
 0xf57   :  { %v854_v11 = vpop.permute.xlu0 %853 }
 0xf58   :  { %v856_v38 = vmul.f32 %v1445_v37, %v854_v11 }
 0xf5a   :  { %858 = vrot.lane.b32.xlu1 %v856_v38, %s1502_s4 }
 0xfcc   :  { %v859_v39 = vpop.permute.xlu1 %858 }
 0xfcd   :  { %v861_v40 = vadd.f32 %v859_v39, %v851_v10 }
 0xfcf   :  { %1446 = vtanh.f32 %v861_v40  ;;  %v963_v60 = vrot.slane %v861_v40, 6 }
 0xfd9   :  { %v1447_v41 = vpop.eup %1446 }
 0xfda   :  { %864 = vrot.lane.b32.xlu0 %v1447_v41, %s1501_s18 }
0x104c   :  { %v865_v43 = vpop.permute.xlu0 %864 }
0x104d   :  { %v867_v44 = vmul.f32 %v1445_v37, %v865_v43 }
0x104f   :  { %v870_v45 = vmul.f32 %v869_v42, %v867_v44  ;;  %v876_v46 = vrot.slane %v867_v44, 2 }
0x1051   :  { %v872_v47 = vrot.slane %v870_v45, 2  ;;  %877 = vrot.lane.b32.xlu1 %v876_v46, %s1502_s4 }
0x1053   :  { %v874_v48 = vadd.f32 %v872_v47, %v761_v26 }
0x10c3   :  { %v878_v49 = vpop.permute.xlu1 %877 }
0x10c4   :  { %1327 = vmatmul.mubr.msk.f32.vlgmr.msra.gmra.mrb[6].mxu1 %vm210_vm3, %v878_v49 }
0x1197   :  { %v947_v50 = vpop.f32.mrb[6].mxu1 }
0x1198   :  { %v952_v51 = vrot.slane %v947_v50, 4  ;;  %v1328_v52 = vpop.f32.mrb[7].mxu1 }
0x119a   :  { %v954_v53 = vadd.f32 %v952_v51, %v1706_v34 }
0x119c   :  { %1448 = vtanh.f32 %v954_v53  ;;  %v1193_v55 = vmul.f32 -1.442695, %v954_v53 }
0x119e   :  { %1450 = vpow2.f32 %v1193_v55 }
0x11a6   :  { %v1449_v54 = vpop.eup %1448 }
0x11a7   :  { %967 = vrot.lane.b32.xlu0 %v1449_v54, %s1501_s18 }
0x11a8   :  { %v1451_v56 = vpop.eup %1450 }
0x11a9   :  { %v958_v57 = vadd.f32 1.0, %v1451_v56 }
0x11ab   :  { %1452 = vrcp.f32 %v958_v57 }
0x11b5   :  { %v1453_v58 = vpop.eup %1452 }
0x11b6   :  { %v965_v61 = vmul.f32 %v1453_v58, %v963_v60 }
0x1219   :  { %v968_v36 = vpop.permute.xlu0 %967 }
0x121a   :  { %v970_v59 = vmul.f32 %v1453_v58, %v968_v36 }
0x121c   :  { %972 = vrot.lane.b32.xlu1 %v970_v59, %s1502_s4 }
0x128e   :  { %v973_v62 = vpop.permute.xlu1 %972 }
0x128f   :  { %v975_v63 = vadd.f32 %v973_v62, %v965_v61 }
0x1291   :  { %1454 = vtanh.f32 %v975_v63 }
0x129b   :  { %v1455_v0 = vpop.eup %1454 }
0x129c   :  { %978 = vrot.lane.b32.xlu0 %v1455_v0, %s1501_s18 }
0x130e   :  { %v979_v2 = vpop.permute.xlu0 %978 }
0x130f   :  { %v981_v3 = vmul.f32 %v1453_v58, %v979_v2 }
0x1311   :  { %v984_v6 = vmul.f32 %v983_v1, %v981_v3  ;;  %v990_v7 = vrot.slane %v981_v3, 4 }
0x1313   :  { %v986_v8 = vrot.slane %v984_v6, 4  ;;  %991 = vrot.lane.b32.xlu1 %v990_v7, %s1502_s4 }
0x1315   :  { %v988_v9 = vadd.f32 %v986_v8, %v874_v48 }
0x1385   :  { %v992_v12 = vpop.permute.xlu1 %991 }
0x1386   :  { %1338 = vmatmul.mubr.msk.f32.vlgmr.msra.gmra.mrb[8].mxu0 %vm210_vm3, %v992_v12 }
0x1459   :  { %v1061_v13 = vpop.f32.mrb[8].mxu0 }
0x145a   :  { %v1066_v14 = vrot.slane %v1061_v13, 2  ;;  %v1339_v15 = vpop.f32.mrb[9].mxu0 }
0x145c   :  { %v1068_v16 = vadd.f32 %v1066_v14, %v1706_v34  ;;  %v1077_v34 = vrot.slane %v975_v63, 6 }
0x145e   :  { %1456 = vtanh.f32 %v1068_v16  ;;  %v1196_v18 = vmul.f32 -1.442695, %v1068_v16 }
0x1460   :  { %1458 = vpow2.f32 %v1196_v18 }
0x1468   :  { %v1457_v17 = vpop.eup %1456 }
0x1469   :  { %1081 = vrot.lane.b32.xlu0 %v1457_v17, %s1501_s18 }
0x146a   :  { %v1459_v19 = vpop.eup %1458 }
0x146b   :  { %v1072_v20 = vadd.f32 1.0, %v1459_v19 }
0x146d   :  { %1460 = vrcp.f32 %v1072_v20 }
0x1477   :  { %v1461_v21 = vpop.eup %1460 }
0x1478   :  { %v1079_v25 = vmul.f32 %v1461_v21, %v1077_v34 }
0x14db   :  { %v1082_v22 = vpop.permute.xlu0 %1081 }
0x14dc   :  { %v1084_v23 = vmul.f32 %v1461_v21, %v1082_v22 }
0x14de   :  { %1086 = vrot.lane.b32.xlu1 %v1084_v23, %s1502_s4 }
0x14e2   :  { %1109 = vrot.lane.b32.xlu1 %v1198_v24, %s1503_s0 }
0x1550   :  { %v1087_v26 = vpop.permute.xlu1 %1086 }
0x1551   :  { %v1089_v27 = vadd.f32 %v1087_v26, %v1079_v25 }
0x1553   :  { %1462 = vtanh.f32 %v1089_v27 }
0x1554   :  { %v1110_v35 = vpop.permute.xlu1 %1109 }
0x155d   :  { %v1463_v28 = vpop.eup %1462 }
0x155e   :  { %1092 = vrot.lane.b32.xlu0 %v1463_v28, %s1501_s18 }
0x15d0   :  { %v1093_v30 = vpop.permute.xlu0 %1092 }
0x15d1   :  { %v1095_v31 = vmul.f32 %v1461_v21, %v1093_v30 }
0x15d3   :  { %v1098_v32 = vmul.f32 %v1097_v29, %v1095_v31 }
0x15d5   :  { %v1100_v33 = vrot.slane %v1098_v32, 6 }
0x15d7   :  { %v1102_v5 = vadd.f32 %v1100_v33, %v988_v9 }
0x15d9   :  { %v1112_v37 = vmul.f32 %v1110_v35, %v1102_v5 }
0x15db   :  { %1114 = vrot.lane.b32.xlu0 %v1112_v37, %s1502_s4 }
0x164d   :  { %v1115_v11 = vpop.permute.xlu0 %1114 }
0x164e   :  { %v1118_v38 = vsel %vm1117_vm4, %v1115_v11, 0.0 }
0x164f   :  { %1119 = vadd.xlane.f32.xlu1 %v1118_v38 }
0x16dc   :  { %v1120_v10 = vpop.xlane.xlu1 %1119 }
0x16dd   :  { %v1128_v39 = vadd.f32 %v1199_v4, %v1120_v10 }
0x16df   :  { %v1200_v40 = vmul.f32 -1.442695, %v1128_v39 }
0x16e1   :  { %1464 = vpow2.f32 %v1200_v40 }
0x16eb   :  { %v1465_v41 = vpop.eup %1464 }
0x16ec   :  { %v1132_v42 = vadd.f32 1.0, %v1465_v41 }
0x16ee   :  { %1466 = vrcp.f32 %v1132_v42 }
0x16f8   :  { %v1467_v43 = vpop.eup %1466 }
0x16f9   :  { %1136 = vst.msk [vmem:[%s1798_s8] sm:$0x3] %vm1135_vm5, %v1467_v43 }
0x16fa   :  { %1141 = vsyncpa [#allocation7], 1 }

</bundles_post_ra>
